<compile_context>
chip_gen: v6e
topology: v6e:2x2x1
jax: 0.10.0
libtpu: 0.0.40
codegen_flags: <defaults>
</compile_context>

<pallas_src>
import functools

import jax
import jax.numpy as jnp
from jax.experimental import pallas as pl
from jax.experimental.pallas import tpu as pltpu

HIDDEN = 32          # config.transformer.hidden_dim
HEADS = 4            # config.transformer.num_heads
HEAD_DIM = HIDDEN // HEADS
MLP_DIM = 128        # config.transformer.mlp_dim (4 * hidden)
LN_EPS = 1e-6        # config.layernorm.layer_norm_eps

PARAM_ORDER = ("wqkv", "bqkv", "wproj", "bproj",
               "g1", "b1",
               "wfc1", "bfc1", "wfc2", "bfc2",
               "g2", "b2")
_WEIGHT_KEYS = ("wqkv", "wproj", "wfc1", "wfc2")


def _layer_norm(h, gamma, beta, eps):
    mu = jnp.mean(h, axis=-1, keepdims=True)
    var = jnp.mean((h - mu) ** 2, axis=-1, keepdims=True)
    return (h - mu) * jax.lax.rsqrt(var + eps) * gamma + beta


def _gelu(h):
    # TODO(synk): PyTorch nn.GELU() default is the exact erf-based GELU; using the
    # tanh approximation here for robust Mosaic lowering (EUP tanh).
    return jax.nn.gelu(h, approximate=True)


def transformer_block_kernel(x_ref,
                             wqkv_ref, bqkv_ref, wproj_ref, bproj_ref,
                             g1_ref, b1_ref,
                             wfc1_ref, bfc1_ref, wfc2_ref, bfc2_ref,
                             g2_ref, b2_ref,
                             o_ref,
                             *, bb, n, d, heads, mm_dtype):
    hd = d // heads
    # (bb, n, d) -> (bb*n, d) token slab: all token-wise matmuls get M = bb*n rows.
    x = x_ref[...].astype(jnp.float32).reshape(bb * n, d)

    def mm(a, w_ref, b_ref=None):
        y = jnp.dot(a.astype(mm_dtype), w_ref[...].astype(mm_dtype),
                    preferred_element_type=jnp.float32)
        if b_ref is not None:
            y = y + b_ref[...].astype(jnp.float32)
        return y

    # ---------------- Attention ----------------
    # Q columns of wqkv/bqkv are pre-scaled by 1/sqrt(head_dim) in prepare_params().
    qkv = mm(x, wqkv_ref, bqkv_ref)                       # (bb*n, 3d), f32
    wproj = wproj_ref[...]

    attn_out = jnp.zeros((bb * n, d), jnp.float32)
    for h in range(heads):                                # static unroll over 4 heads
        q_h = qkv[:, h * hd:(h + 1) * hd].reshape(bb, n, hd)
        k_h = qkv[:, d + h * hd: d + (h + 1) * hd].reshape(bb, n, hd)
        v_h = qkv[:, 2 * d + h * hd: 2 * d + (h + 1) * hd].reshape(bb, n, hd)

        s = jnp.einsum('bqd,bkd->bqk', q_h.astype(mm_dtype), k_h.astype(mm_dtype),
                       preferred_element_type=jnp.float32)        # (bb, n, n)
        s = s - jnp.max(s, axis=-1, keepdims=True)
        p = jnp.exp(s)
        p = p * pl.reciprocal(jnp.sum(p, axis=-1, keepdims=True), approx=True)

        ctx = jnp.einsum('bqk,bkd->bqd', p.astype(mm_dtype), v_h.astype(mm_dtype),
                         preferred_element_type=jnp.float32)      # (bb, n, hd)

        # Fold this head's context through its slice of W_proj (no lane concat).
        attn_out = attn_out + jnp.dot(
            ctx.reshape(bb * n, hd).astype(mm_dtype),
            wproj[h * hd:(h + 1) * hd, :].astype(mm_dtype),
            preferred_element_type=jnp.float32)
    attn_out = attn_out + bproj_ref[...].astype(jnp.float32)

    # residual + post-attention LayerNorm (f32 elementwise)
    h1 = _layer_norm(x + attn_out, g1_ref[...].astype(jnp.float32),
                     b1_ref[...].astype(jnp.float32), LN_EPS)

    # ---------------- MLP ----------------
    hid = _gelu(mm(h1, wfc1_ref, bfc1_ref))
    mlp_out = mm(hid, wfc2_ref, bfc2_ref)

    # residual + post-MLP LayerNorm
    h2 = _layer_norm(h1 + mlp_out, g2_ref[...].astype(jnp.float32),
                     b2_ref[...].astype(jnp.float32), LN_EPS)

    o_ref[...] = h2.reshape(bb, n, d).astype(o_ref.dtype)


def _choose_block_batch(B, N, target_tokens=256):
    """Batch elements per grid step: fill ~target_tokens rows, keep >=2 grid steps."""
    bb = max(1, target_tokens // max(N, 1))
    if B >= 2:
        bb = min(bb, B // 2)        # >= 2 grid steps (v7x has 2 TensorCores)
    bb = max(1, min(bb, B))
    while B % bb:                   # evenly divide B (no ragged blocks)
        bb -= 1
    return bb


def transformer_block(x, params, *, matmul_dtype=jnp.float32, block_batch=None):
    B, N, D = x.shape
    assert D == HIDDEN

    bb = block_batch if block_batch is not None else _choose_block_batch(B, N)
    assert B % bb == 0
    grid = (B // bb,)

    plist = []
    for k in PARAM_ORDER:
        p = params[k]
        if k in _WEIGHT_KEYS and matmul_dtype != jnp.float32:
            p = p.astype(matmul_dtype)      # halve weight DMA bytes on v6e/v7x
        plist.append(p)

    in_specs = [pl.BlockSpec((bb, N, D), lambda g: (g, 0, 0))]
    for p in plist:
        assert p.ndim == 2
        in_specs.append(pl.BlockSpec(p.shape, lambda g: (0, 0)))
    out_specs = pl.BlockSpec((bb, N, D), lambda g: (g, 0, 0))

    kernel = functools.partial(transformer_block_kernel,
                               bb=bb, n=N, d=D, heads=HEADS, mm_dtype=matmul_dtype)

    return pl.pallas_call(
        kernel,
        out_shape=jax.ShapeDtypeStruct((B, N, D), x.dtype),
        grid=grid,
        in_specs=in_specs,
        out_specs=out_specs,
        compiler_params=pltpu.CompilerParams(dimension_semantics=("parallel",)),
    )(x, *plist)


def init_params(key):
    ks = jax.random.split(key, 8)

    def w(k, fan_in, fan_out):
        return jax.random.normal(k, (fan_in, fan_out), jnp.float32) * 0.02

    def b(k, n):
        return jax.random.normal(k, (1, n), jnp.float32) * 0.02

    return dict(
        wqkv=w(ks[0], HIDDEN, 3 * HIDDEN), bqkv=b(ks[1], 3 * HIDDEN),
        wproj=w(ks[2], HIDDEN, HIDDEN),    bproj=b(ks[3], HIDDEN),
        g1=jnp.ones((1, HIDDEN), jnp.float32), b1=jnp.zeros((1, HIDDEN), jnp.float32),
        wfc1=w(ks[4], HIDDEN, MLP_DIM),    bfc1=b(ks[5], MLP_DIM),
        wfc2=w(ks[6], MLP_DIM, HIDDEN),    bfc2=b(ks[7], HIDDEN),
        g2=jnp.ones((1, HIDDEN), jnp.float32), b2=jnp.zeros((1, HIDDEN), jnp.float32),
    )


def prepare_params(params):
    """One-time constant fold of the 1/sqrt(head_dim) attention scale into Q cols."""
    scale = HEAD_DIM ** -0.5
    p = dict(params)
    p["wqkv"] = params["wqkv"].at[:, :HIDDEN].multiply(scale)
    p["bqkv"] = params["bqkv"].at[:, :HIDDEN].multiply(scale)
    return p


def reference(x, params):
    """Pure-JAX reference of the original (unscaled-weight) forward pass."""
    B, N, D = x.shape
    qkv = x @ params["wqkv"] + params["bqkv"]
    q, k, v = jnp.split(qkv, 3, axis=-1)
    q = q.reshape(B, N, HEADS, HEAD_DIM).transpose(0, 2, 1, 3)
    k = k.reshape(B, N, HEADS, HEAD_DIM).transpose(0, 2, 1, 3)
    v = v.reshape(B, N, HEADS, HEAD_DIM).transpose(0, 2, 1, 3)
    s = jnp.einsum('bhqd,bhkd->bhqk', q, k) * (HEAD_DIM ** -0.5)
    p = jax.nn.softmax(s, axis=-1)
    ctx = jnp.einsum('bhqk,bhkd->bhqd', p, v).transpose(0, 2, 1, 3).reshape(B, N, D)
    attn_out = ctx @ params["wproj"] + params["bproj"]
    h1 = _layer_norm(x + attn_out, params["g1"], params["b1"], LN_EPS)
    hid = _gelu(h1 @ params["wfc1"] + params["bfc1"])
    mlp_out = hid @ params["wfc2"] + params["bfc2"]
    return _layer_norm(h1 + mlp_out, params["g2"], params["b2"], LN_EPS)


if __name__ == "__main__":
    key = jax.random.PRNGKey(0)
    kx, kp, kx2 = jax.random.split(key, 3)

    # Small shapes consistent with the module config (hidden=32, heads=4, mlp=128).
    B, N = 2, 8
    x = jax.random.normal(kx, (B, N, HIDDEN), jnp.float32)
    params = init_params(kp)
    kparams = prepare_params(params)       # one-time scale fold (not per call)

    out = jax.block_until_ready(transformer_block(x, kparams))
    ref = reference(x, params)
    assert out.shape == (B, N, HIDDEN)
    assert jnp.allclose(out, ref, atol=2e-3, rtol=2e-3), \
        "Pallas kernel mismatch vs JAX reference (f32 path)"

    # Larger batch exercises multiple batch elements per grid step (bb > 1).
    B2 = 8
    x2 = jax.random.normal(kx2, (B2, N, HIDDEN), jnp.float32)
    out2 = jax.block_until_ready(transformer_block(x2, kparams))
    assert jnp.allclose(out2, reference(x2, params), atol=2e-3, rtol=2e-3), \
        "Pallas kernel mismatch vs JAX reference (batched path)"

    # bf16 matmul operands (v6e/v7x MXU path); elementwise math stays f32.
    out_bf16 = jax.block_until_ready(
        transformer_block(x2, kparams, matmul_dtype=jnp.bfloat16))
    assert jnp.allclose(out_bf16, reference(x2, params), atol=5e-2, rtol=5e-2), \
        "Pallas kernel mismatch vs JAX reference (bf16 matmul path)"

    print("KERNEL_OK")
</pallas_src>

<mosaic_0001>
module attributes {stable_mosaic.version = 11 : i64} {
  func.func @transformer_block_kernel(%arg0: i32, %arg1: memref<1x8x32xf32, #tpu.memory_space<vmem>>, %arg2: memref<32x96xf32, #tpu.memory_space<vmem>>, %arg3: memref<1x96xf32, #tpu.memory_space<vmem>>, %arg4: memref<32x32xf32, #tpu.memory_space<vmem>>, %arg5: memref<1x32xf32, #tpu.memory_space<vmem>>, %arg6: memref<1x32xf32, #tpu.memory_space<vmem>>, %arg7: memref<1x32xf32, #tpu.memory_space<vmem>>, %arg8: memref<32x128xf32, #tpu.memory_space<vmem>>, %arg9: memref<1x128xf32, #tpu.memory_space<vmem>>, %arg10: memref<128x32xf32, #tpu.memory_space<vmem>>, %arg11: memref<1x32xf32, #tpu.memory_space<vmem>>, %arg12: memref<1x32xf32, #tpu.memory_space<vmem>>, %arg13: memref<1x32xf32, #tpu.memory_space<vmem>>, %arg14: memref<1x8x32xf32, #tpu.memory_space<vmem>>) attributes {dimension_semantics = [#tpu.dimension_semantics<parallel>], iteration_bounds = array<i64: 2>, scalar_prefetch = 0 : i64, scratch_operands = 0 : i64, tpu.core_type = #tpu.core_type<tc>, window_params = [{transform_indices = @transform_0, window_bounds = array<i64: 1, 8, 32>}, {pipeline_mode = #tpu.pipeline_mode<synchronous>, transform_indices = @transform_1, window_bounds = array<i64: 32, 96>}, {pipeline_mode = #tpu.pipeline_mode<synchronous>, transform_indices = @transform_2, window_bounds = array<i64: 1, 96>}, {pipeline_mode = #tpu.pipeline_mode<synchronous>, transform_indices = @transform_3, window_bounds = array<i64: 32, 32>}, {pipeline_mode = #tpu.pipeline_mode<synchronous>, transform_indices = @transform_4, window_bounds = array<i64: 1, 32>}, {pipeline_mode = #tpu.pipeline_mode<synchronous>, transform_indices = @transform_5, window_bounds = array<i64: 1, 32>}, {pipeline_mode = #tpu.pipeline_mode<synchronous>, transform_indices = @transform_6, window_bounds = array<i64: 1, 32>}, {pipeline_mode = #tpu.pipeline_mode<synchronous>, transform_indices = @transform_7, window_bounds = array<i64: 32, 128>}, {pipeline_mode = #tpu.pipeline_mode<synchronous>, transform_indices = @transform_8, window_bounds = array<i64: 1, 128>}, {pipeline_mode = #tpu.pipeline_mode<synchronous>, transform_indices = @transform_9, window_bounds = array<i64: 128, 32>}, {pipeline_mode = #tpu.pipeline_mode<synchronous>, transform_indices = @transform_10, window_bounds = array<i64: 1, 32>}, {pipeline_mode = #tpu.pipeline_mode<synchronous>, transform_indices = @transform_11, window_bounds = array<i64: 1, 32>}, {pipeline_mode = #tpu.pipeline_mode<synchronous>, transform_indices = @transform_12, window_bounds = array<i64: 1, 32>}, {transform_indices = @transform_13, window_bounds = array<i64: 1, 8, 32>}]} {
    %c0 = arith.constant 0 : index
    %c0_0 = arith.constant 0 : index
    %c0_1 = arith.constant 0 : index
    %0 = vector.load %arg1[%c0, %c0_0, %c0_1] : memref<1x8x32xf32, #tpu.memory_space<vmem>>, vector<1x8x32xf32>
    %1 = vector.shape_cast %0 : vector<1x8x32xf32> to vector<8x32xf32>
    %c0_2 = arith.constant 0 : index
    %c0_3 = arith.constant 0 : index
    %2 = vector.load %arg2[%c0_2, %c0_3] : memref<32x96xf32, #tpu.memory_space<vmem>>, vector<32x96xf32>
    %cst = arith.constant dense<0.000000e+00> : vector<8x96xf32>
    %3 = tpu.matmul %1, %2, %cst {dimension_numbers = #tpu.dot_dimension_numbers<[1], [0], [0], [1], [0, 0, 1, 1], [], []>} : vector<8x32xf32>, vector<32x96xf32>, vector<8x96xf32> -> vector<8x96xf32>
    %c0_4 = arith.constant 0 : index
    %c0_5 = arith.constant 0 : index
    %4 = vector.load %arg3[%c0_4, %c0_5] : memref<1x96xf32, #tpu.memory_space<vmem>>, vector<1x96xf32>
    %5 = vector.broadcast %4 : vector<1x96xf32> to vector<8x96xf32>
    %6 = arith.addf %3, %5 : vector<8x96xf32>
    %c0_6 = arith.constant 0 : index
    %c0_7 = arith.constant 0 : index
    %7 = vector.load %arg4[%c0_6, %c0_7] : memref<32x32xf32, #tpu.memory_space<vmem>>, vector<32x32xf32>
    %cst_8 = arith.constant 0.000000e+00 : f32
    %8 = vector.broadcast %cst_8 : f32 to vector<8x32xf32>
    %9 = vector.extract_strided_slice %6 {offsets = [0, 0], sizes = [8, 8], strides = [1, 1]} : vector<8x96xf32> to vector<8x8xf32>
    %10 = vector.shape_cast %9 : vector<8x8xf32> to vector<1x8x8xf32>
    %11 = vector.extract_strided_slice %6 {offsets = [0, 32], sizes = [8, 8], strides = [1, 1]} : vector<8x96xf32> to vector<8x8xf32>
    %12 = vector.shape_cast %11 : vector<8x8xf32> to vector<1x8x8xf32>
    %13 = vector.extract_strided_slice %6 {offsets = [0, 64], sizes = [8, 8], strides = [1, 1]} : vector<8x96xf32> to vector<8x8xf32>
    %14 = vector.shape_cast %13 : vector<8x8xf32> to vector<1x8x8xf32>
    "tpu.trace_start"() <{level = 10 : i32, message = "bqd,bkd->bqk"}> : () -> ()
    %cst_9 = arith.constant dense<0.000000e+00> : vector<1x8x8xf32>
    %15 = tpu.matmul %10, %12, %cst_9 {dimension_numbers = #tpu.dot_dimension_numbers<[2], [2], [1], [1], [0, 0, 0, 1, 1, 1], [0], [0]>} : vector<1x8x8xf32>, vector<1x8x8xf32>, vector<1x8x8xf32> -> vector<1x8x8xf32>
    "tpu.trace_stop"() : () -> ()
    %cst_10 = arith.constant dense<0xFF800000> : vector<1x8xf32>
    %16 = vector.multi_reduction <maximumf>, %15, %cst_10 [2] : vector<1x8x8xf32> to vector<1x8xf32>
    %17 = vector.shape_cast %16 : vector<1x8xf32> to vector<1x8x1xf32>
    %18 = vector.broadcast %17 : vector<1x8x1xf32> to vector<1x8x8xf32>
    %19 = arith.subf %15, %18 : vector<1x8x8xf32>
    %20 = math.exp %19 : vector<1x8x8xf32>
    %cst_11 = arith.constant dense<0.000000e+00> : vector<1x8xf32>
    %21 = vector.multi_reduction <add>, %20, %cst_11 [2] : vector<1x8x8xf32> to vector<1x8xf32>
    %22 = vector.shape_cast %21 : vector<1x8xf32> to vector<1x8x1xf32>
    %23 = tpu.reciprocal %22 {approx = true} : vector<1x8x1xf32> -> vector<1x8x1xf32>
    %24 = vector.broadcast %23 : vector<1x8x1xf32> to vector<1x8x8xf32>
    %25 = arith.mulf %20, %24 : vector<1x8x8xf32>
    "tpu.trace_start"() <{level = 10 : i32, message = "bqk,bkd->bqd"}> : () -> ()
    %cst_12 = arith.constant dense<0.000000e+00> : vector<1x8x8xf32>
    %26 = tpu.matmul %25, %14, %cst_12 {dimension_numbers = #tpu.dot_dimension_numbers<[2], [1], [1], [2], [0, 0, 0, 1, 1, 2], [0], [0]>} : vector<1x8x8xf32>, vector<1x8x8xf32>, vector<1x8x8xf32> -> vector<1x8x8xf32>
    "tpu.trace_stop"() : () -> ()
    %27 = vector.shape_cast %26 : vector<1x8x8xf32> to vector<8x8xf32>
    %28 = vector.extract_strided_slice %7 {offsets = [0, 0], sizes = [8, 32], strides = [1, 1]} : vector<32x32xf32> to vector<8x32xf32>
    %cst_13 = arith.constant dense<0.000000e+00> : vector<8x32xf32>
    %29 = tpu.matmul %27, %28, %cst_13 {dimension_numbers = #tpu.dot_dimension_numbers<[1], [0], [0], [1], [0, 0, 1, 1], [], []>} : vector<8x8xf32>, vector<8x32xf32>, vector<8x32xf32> -> vector<8x32xf32>
    %30 = arith.addf %8, %29 : vector<8x32xf32>
    %31 = vector.extract_strided_slice %6 {offsets = [0, 8], sizes = [8, 8], strides = [1, 1]} : vector<8x96xf32> to vector<8x8xf32>
    %32 = vector.shape_cast %31 : vector<8x8xf32> to vector<1x8x8xf32>
    %33 = vector.extract_strided_slice %6 {offsets = [0, 40], sizes = [8, 8], strides = [1, 1]} : vector<8x96xf32> to vector<8x8xf32>
    %34 = vector.shape_cast %33 : vector<8x8xf32> to vector<1x8x8xf32>
    %35 = vector.extract_strided_slice %6 {offsets = [0, 72], sizes = [8, 8], strides = [1, 1]} : vector<8x96xf32> to vector<8x8xf32>
    %36 = vector.shape_cast %35 : vector<8x8xf32> to vector<1x8x8xf32>
    "tpu.trace_start"() <{level = 10 : i32, message = "bqd,bkd->bqk"}> : () -> ()
    %cst_14 = arith.constant dense<0.000000e+00> : vector<1x8x8xf32>
    %37 = tpu.matmul %32, %34, %cst_14 {dimension_numbers = #tpu.dot_dimension_numbers<[2], [2], [1], [1], [0, 0, 0, 1, 1, 1], [0], [0]>} : vector<1x8x8xf32>, vector<1x8x8xf32>, vector<1x8x8xf32> -> vector<1x8x8xf32>
    "tpu.trace_stop"() : () -> ()
    %cst_15 = arith.constant dense<0xFF800000> : vector<1x8xf32>
    %38 = vector.multi_reduction <maximumf>, %37, %cst_15 [2] : vector<1x8x8xf32> to vector<1x8xf32>
    %39 = vector.shape_cast %38 : vector<1x8xf32> to vector<1x8x1xf32>
    %40 = vector.broadcast %39 : vector<1x8x1xf32> to vector<1x8x8xf32>
    %41 = arith.subf %37, %40 : vector<1x8x8xf32>
    %42 = math.exp %41 : vector<1x8x8xf32>
    %cst_16 = arith.constant dense<0.000000e+00> : vector<1x8xf32>
    %43 = vector.multi_reduction <add>, %42, %cst_16 [2] : vector<1x8x8xf32> to vector<1x8xf32>
    %44 = vector.shape_cast %43 : vector<1x8xf32> to vector<1x8x1xf32>
    %45 = tpu.reciprocal %44 {approx = true} : vector<1x8x1xf32> -> vector<1x8x1xf32>
    %46 = vector.broadcast %45 : vector<1x8x1xf32> to vector<1x8x8xf32>
    %47 = arith.mulf %42, %46 : vector<1x8x8xf32>
    "tpu.trace_start"() <{level = 10 : i32, message = "bqk,bkd->bqd"}> : () -> ()
    %cst_17 = arith.constant dense<0.000000e+00> : vector<1x8x8xf32>
    %48 = tpu.matmul %47, %36, %cst_17 {dimension_numbers = #tpu.dot_dimension_numbers<[2], [1], [1], [2], [0, 0, 0, 1, 1, 2], [0], [0]>} : vector<1x8x8xf32>, vector<1x8x8xf32>, vector<1x8x8xf32> -> vector<1x8x8xf32>
    "tpu.trace_stop"() : () -> ()
    %49 = vector.shape_cast %48 : vector<1x8x8xf32> to vector<8x8xf32>
    %50 = vector.extract_strided_slice %7 {offsets = [8, 0], sizes = [8, 32], strides = [1, 1]} : vector<32x32xf32> to vector<8x32xf32>
    %cst_18 = arith.constant dense<0.000000e+00> : vector<8x32xf32>
    %51 = tpu.matmul %49, %50, %cst_18 {dimension_numbers = #tpu.dot_dimension_numbers<[1], [0], [0], [1], [0, 0, 1, 1], [], []>} : vector<8x8xf32>, vector<8x32xf32>, vector<8x32xf32> -> vector<8x32xf32>
    %52 = arith.addf %30, %51 : vector<8x32xf32>
    %53 = vector.extract_strided_slice %6 {offsets = [0, 16], sizes = [8, 8], strides = [1, 1]} : vector<8x96xf32> to vector<8x8xf32>
    %54 = vector.shape_cast %53 : vector<8x8xf32> to vector<1x8x8xf32>
    %55 = vector.extract_strided_slice %6 {offsets = [0, 48], sizes = [8, 8], strides = [1, 1]} : vector<8x96xf32> to vector<8x8xf32>
    %56 = vector.shape_cast %55 : vector<8x8xf32> to vector<1x8x8xf32>
    %57 = vector.extract_strided_slice %6 {offsets = [0, 80], sizes = [8, 8], strides = [1, 1]} : vector<8x96xf32> to vector<8x8xf32>
    %58 = vector.shape_cast %57 : vector<8x8xf32> to vector<1x8x8xf32>
    "tpu.trace_start"() <{level = 10 : i32, message = "bqd,bkd->bqk"}> : () -> ()
    %cst_19 = arith.constant dense<0.000000e+00> : vector<1x8x8xf32>
    %59 = tpu.matmul %54, %56, %cst_19 {dimension_numbers = #tpu.dot_dimension_numbers<[2], [2], [1], [1], [0, 0, 0, 1, 1, 1], [0], [0]>} : vector<1x8x8xf32>, vector<1x8x8xf32>, vector<1x8x8xf32> -> vector<1x8x8xf32>
    "tpu.trace_stop"() : () -> ()
    %cst_20 = arith.constant dense<0xFF800000> : vector<1x8xf32>
    %60 = vector.multi_reduction <maximumf>, %59, %cst_20 [2] : vector<1x8x8xf32> to vector<1x8xf32>
    %61 = vector.shape_cast %60 : vector<1x8xf32> to vector<1x8x1xf32>
    %62 = vector.broadcast %61 : vector<1x8x1xf32> to vector<1x8x8xf32>
    %63 = arith.subf %59, %62 : vector<1x8x8xf32>
    %64 = math.exp %63 : vector<1x8x8xf32>
    %cst_21 = arith.constant dense<0.000000e+00> : vector<1x8xf32>
    %65 = vector.multi_reduction <add>, %64, %cst_21 [2] : vector<1x8x8xf32> to vector<1x8xf32>
    %66 = vector.shape_cast %65 : vector<1x8xf32> to vector<1x8x1xf32>
    %67 = tpu.reciprocal %66 {approx = true} : vector<1x8x1xf32> -> vector<1x8x1xf32>
    %68 = vector.broadcast %67 : vector<1x8x1xf32> to vector<1x8x8xf32>
    %69 = arith.mulf %64, %68 : vector<1x8x8xf32>
    "tpu.trace_start"() <{level = 10 : i32, message = "bqk,bkd->bqd"}> : () -> ()
    %cst_22 = arith.constant dense<0.000000e+00> : vector<1x8x8xf32>
    %70 = tpu.matmul %69, %58, %cst_22 {dimension_numbers = #tpu.dot_dimension_numbers<[2], [1], [1], [2], [0, 0, 0, 1, 1, 2], [0], [0]>} : vector<1x8x8xf32>, vector<1x8x8xf32>, vector<1x8x8xf32> -> vector<1x8x8xf32>
    "tpu.trace_stop"() : () -> ()
    %71 = vector.shape_cast %70 : vector<1x8x8xf32> to vector<8x8xf32>
    %72 = vector.extract_strided_slice %7 {offsets = [16, 0], sizes = [8, 32], strides = [1, 1]} : vector<32x32xf32> to vector<8x32xf32>
    %cst_23 = arith.constant dense<0.000000e+00> : vector<8x32xf32>
    %73 = tpu.matmul %71, %72, %cst_23 {dimension_numbers = #tpu.dot_dimension_numbers<[1], [0], [0], [1], [0, 0, 1, 1], [], []>} : vector<8x8xf32>, vector<8x32xf32>, vector<8x32xf32> -> vector<8x32xf32>
    %74 = arith.addf %52, %73 : vector<8x32xf32>
    %75 = vector.extract_strided_slice %6 {offsets = [0, 24], sizes = [8, 8], strides = [1, 1]} : vector<8x96xf32> to vector<8x8xf32>
    %76 = vector.shape_cast %75 : vector<8x8xf32> to vector<1x8x8xf32>
    %77 = vector.extract_strided_slice %6 {offsets = [0, 56], sizes = [8, 8], strides = [1, 1]} : vector<8x96xf32> to vector<8x8xf32>
    %78 = vector.shape_cast %77 : vector<8x8xf32> to vector<1x8x8xf32>
    %79 = vector.extract_strided_slice %6 {offsets = [0, 88], sizes = [8, 8], strides = [1, 1]} : vector<8x96xf32> to vector<8x8xf32>
    %80 = vector.shape_cast %79 : vector<8x8xf32> to vector<1x8x8xf32>
    "tpu.trace_start"() <{level = 10 : i32, message = "bqd,bkd->bqk"}> : () -> ()
    %cst_24 = arith.constant dense<0.000000e+00> : vector<1x8x8xf32>
    %81 = tpu.matmul %76, %78, %cst_24 {dimension_numbers = #tpu.dot_dimension_numbers<[2], [2], [1], [1], [0, 0, 0, 1, 1, 1], [0], [0]>} : vector<1x8x8xf32>, vector<1x8x8xf32>, vector<1x8x8xf32> -> vector<1x8x8xf32>
    "tpu.trace_stop"() : () -> ()
    %cst_25 = arith.constant dense<0xFF800000> : vector<1x8xf32>
    %82 = vector.multi_reduction <maximumf>, %81, %cst_25 [2] : vector<1x8x8xf32> to vector<1x8xf32>
    %83 = vector.shape_cast %82 : vector<1x8xf32> to vector<1x8x1xf32>
    %84 = vector.broadcast %83 : vector<1x8x1xf32> to vector<1x8x8xf32>
    %85 = arith.subf %81, %84 : vector<1x8x8xf32>
    %86 = math.exp %85 : vector<1x8x8xf32>
    %cst_26 = arith.constant dense<0.000000e+00> : vector<1x8xf32>
    %87 = vector.multi_reduction <add>, %86, %cst_26 [2] : vector<1x8x8xf32> to vector<1x8xf32>
    %88 = vector.shape_cast %87 : vector<1x8xf32> to vector<1x8x1xf32>
    %89 = tpu.reciprocal %88 {approx = true} : vector<1x8x1xf32> -> vector<1x8x1xf32>
    %90 = vector.broadcast %89 : vector<1x8x1xf32> to vector<1x8x8xf32>
    %91 = arith.mulf %86, %90 : vector<1x8x8xf32>
    "tpu.trace_start"() <{level = 10 : i32, message = "bqk,bkd->bqd"}> : () -> ()
    %cst_27 = arith.constant dense<0.000000e+00> : vector<1x8x8xf32>
    %92 = tpu.matmul %91, %80, %cst_27 {dimension_numbers = #tpu.dot_dimension_numbers<[2], [1], [1], [2], [0, 0, 0, 1, 1, 2], [0], [0]>} : vector<1x8x8xf32>, vector<1x8x8xf32>, vector<1x8x8xf32> -> vector<1x8x8xf32>
    "tpu.trace_stop"() : () -> ()
    %93 = vector.shape_cast %92 : vector<1x8x8xf32> to vector<8x8xf32>
    %94 = vector.extract_strided_slice %7 {offsets = [24, 0], sizes = [8, 32], strides = [1, 1]} : vector<32x32xf32> to vector<8x32xf32>
    %cst_28 = arith.constant dense<0.000000e+00> : vector<8x32xf32>
    %95 = tpu.matmul %93, %94, %cst_28 {dimension_numbers = #tpu.dot_dimension_numbers<[1], [0], [0], [1], [0, 0, 1, 1], [], []>} : vector<8x8xf32>, vector<8x32xf32>, vector<8x32xf32> -> vector<8x32xf32>
    %96 = arith.addf %74, %95 : vector<8x32xf32>
    %c0_29 = arith.constant 0 : index
    %c0_30 = arith.constant 0 : index
    %97 = vector.load %arg5[%c0_29, %c0_30] : memref<1x32xf32, #tpu.memory_space<vmem>>, vector<1x32xf32>
    %98 = vector.broadcast %97 : vector<1x32xf32> to vector<8x32xf32>
    %99 = arith.addf %96, %98 : vector<8x32xf32>
    %100 = arith.addf %1, %99 : vector<8x32xf32>
    %c0_31 = arith.constant 0 : index
    %c0_32 = arith.constant 0 : index
    %101 = vector.load %arg6[%c0_31, %c0_32] : memref<1x32xf32, #tpu.memory_space<vmem>>, vector<1x32xf32>
    %c0_33 = arith.constant 0 : index
    %c0_34 = arith.constant 0 : index
    %102 = vector.load %arg7[%c0_33, %c0_34] : memref<1x32xf32, #tpu.memory_space<vmem>>, vector<1x32xf32>
    %cst_35 = arith.constant dense<0.000000e+00> : vector<8xf32>
    %103 = vector.multi_reduction <add>, %100, %cst_35 [1] : vector<8x32xf32> to vector<8xf32>
    %104 = vector.shape_cast %103 : vector<8xf32> to vector<8x1xf32>
    %cst_36 = arith.constant 3.200000e+01 : f32
    %105 = vector.broadcast %cst_36 : f32 to vector<8x1xf32>
    %106 = arith.divf %104, %105 : vector<8x1xf32>
    %107 = vector.broadcast %106 : vector<8x1xf32> to vector<8x32xf32>
    %108 = arith.subf %100, %107 : vector<8x32xf32>
    %109 = arith.mulf %108, %108 : vector<8x32xf32>
    %cst_37 = arith.constant dense<0.000000e+00> : vector<8xf32>
    %110 = vector.multi_reduction <add>, %109, %cst_37 [1] : vector<8x32xf32> to vector<8xf32>
    %111 = vector.shape_cast %110 : vector<8xf32> to vector<8x1xf32>
    %cst_38 = arith.constant 3.200000e+01 : f32
    %112 = vector.broadcast %cst_38 : f32 to vector<8x1xf32>
    %113 = arith.divf %111, %112 : vector<8x1xf32>
    %114 = vector.broadcast %106 : vector<8x1xf32> to vector<8x32xf32>
    %115 = arith.subf %100, %114 : vector<8x32xf32>
    %cst_39 = arith.constant 9.99999997E-7 : f32
    %116 = vector.broadcast %cst_39 : f32 to vector<8x1xf32>
    %117 = arith.addf %113, %116 : vector<8x1xf32>
    %118 = math.rsqrt %117 : vector<8x1xf32>
    %119 = vector.broadcast %118 : vector<8x1xf32> to vector<8x32xf32>
    %120 = arith.mulf %115, %119 : vector<8x32xf32>
    %121 = vector.broadcast %101 : vector<1x32xf32> to vector<8x32xf32>
    %122 = arith.mulf %120, %121 : vector<8x32xf32>
    %123 = vector.broadcast %102 : vector<1x32xf32> to vector<8x32xf32>
    %124 = arith.addf %122, %123 : vector<8x32xf32>
    %c0_40 = arith.constant 0 : index
    %c0_41 = arith.constant 0 : index
    %125 = vector.load %arg8[%c0_40, %c0_41] : memref<32x128xf32, #tpu.memory_space<vmem>>, vector<32x128xf32>
    %cst_42 = arith.constant dense<0.000000e+00> : vector<8x128xf32>
    %126 = tpu.matmul %124, %125, %cst_42 {dimension_numbers = #tpu.dot_dimension_numbers<[1], [0], [0], [1], [0, 0, 1, 1], [], []>} : vector<8x32xf32>, vector<32x128xf32>, vector<8x128xf32> -> vector<8x128xf32>
    %c0_43 = arith.constant 0 : index
    %c0_44 = arith.constant 0 : index
    %127 = vector.load %arg9[%c0_43, %c0_44] : memref<1x128xf32, #tpu.memory_space<vmem>>, vector<1x128xf32>
    %128 = vector.broadcast %127 : vector<1x128xf32> to vector<8x128xf32>
    %129 = arith.addf %126, %128 : vector<8x128xf32>
    %130 = arith.mulf %129, %129 : vector<8x128xf32>
    %131 = arith.mulf %129, %130 : vector<8x128xf32>
    %cst_45 = arith.constant 4.471500e-02 : f32
    %132 = vector.broadcast %cst_45 : f32 to vector<8x128xf32>
    %133 = arith.mulf %132, %131 : vector<8x128xf32>
    %134 = arith.addf %129, %133 : vector<8x128xf32>
    %cst_46 = arith.constant 0.797884583 : f32
    %135 = vector.broadcast %cst_46 : f32 to vector<8x128xf32>
    %136 = arith.mulf %135, %134 : vector<8x128xf32>
    %137 = math.tanh %136 : vector<8x128xf32>
    %cst_47 = arith.constant 1.000000e+00 : f32
    %138 = vector.broadcast %cst_47 : f32 to vector<8x128xf32>
    %139 = arith.addf %138, %137 : vector<8x128xf32>
    %cst_48 = arith.constant 5.000000e-01 : f32
    %140 = vector.broadcast %cst_48 : f32 to vector<8x128xf32>
    %141 = arith.mulf %140, %139 : vector<8x128xf32>
    %142 = arith.mulf %129, %141 : vector<8x128xf32>
    %c0_49 = arith.constant 0 : index
    %c0_50 = arith.constant 0 : index
    %143 = vector.load %arg10[%c0_49, %c0_50] : memref<128x32xf32, #tpu.memory_space<vmem>>, vector<128x32xf32>
    %cst_51 = arith.constant dense<0.000000e+00> : vector<8x32xf32>
    %144 = tpu.matmul %142, %143, %cst_51 {dimension_numbers = #tpu.dot_dimension_numbers<[1], [0], [0], [1], [0, 0, 1, 1], [], []>} : vector<8x128xf32>, vector<128x32xf32>, vector<8x32xf32> -> vector<8x32xf32>
    %c0_52 = arith.constant 0 : index
    %c0_53 = arith.constant 0 : index
    %145 = vector.load %arg11[%c0_52, %c0_53] : memref<1x32xf32, #tpu.memory_space<vmem>>, vector<1x32xf32>
    %146 = vector.broadcast %145 : vector<1x32xf32> to vector<8x32xf32>
    %147 = arith.addf %144, %146 : vector<8x32xf32>
    %148 = arith.addf %124, %147 : vector<8x32xf32>
    %c0_54 = arith.constant 0 : index
    %c0_55 = arith.constant 0 : index
    %149 = vector.load %arg12[%c0_54, %c0_55] : memref<1x32xf32, #tpu.memory_space<vmem>>, vector<1x32xf32>
    %c0_56 = arith.constant 0 : index
    %c0_57 = arith.constant 0 : index
    %150 = vector.load %arg13[%c0_56, %c0_57] : memref<1x32xf32, #tpu.memory_space<vmem>>, vector<1x32xf32>
    %cst_58 = arith.constant dense<0.000000e+00> : vector<8xf32>
    %151 = vector.multi_reduction <add>, %148, %cst_58 [1] : vector<8x32xf32> to vector<8xf32>
    %152 = vector.shape_cast %151 : vector<8xf32> to vector<8x1xf32>
    %cst_59 = arith.constant 3.200000e+01 : f32
    %153 = vector.broadcast %cst_59 : f32 to vector<8x1xf32>
    %154 = arith.divf %152, %153 : vector<8x1xf32>
    %155 = vector.broadcast %154 : vector<8x1xf32> to vector<8x32xf32>
    %156 = arith.subf %148, %155 : vector<8x32xf32>
    %157 = arith.mulf %156, %156 : vector<8x32xf32>
    %cst_60 = arith.constant dense<0.000000e+00> : vector<8xf32>
    %158 = vector.multi_reduction <add>, %157, %cst_60 [1] : vector<8x32xf32> to vector<8xf32>
    %159 = vector.shape_cast %158 : vector<8xf32> to vector<8x1xf32>
    %cst_61 = arith.constant 3.200000e+01 : f32
    %160 = vector.broadcast %cst_61 : f32 to vector<8x1xf32>
    %161 = arith.divf %159, %160 : vector<8x1xf32>
    %162 = vector.broadcast %154 : vector<8x1xf32> to vector<8x32xf32>
    %163 = arith.subf %148, %162 : vector<8x32xf32>
    %cst_62 = arith.constant 9.99999997E-7 : f32
    %164 = vector.broadcast %cst_62 : f32 to vector<8x1xf32>
    %165 = arith.addf %161, %164 : vector<8x1xf32>
    %166 = math.rsqrt %165 : vector<8x1xf32>
    %167 = vector.broadcast %166 : vector<8x1xf32> to vector<8x32xf32>
    %168 = arith.mulf %163, %167 : vector<8x32xf32>
    %169 = vector.broadcast %149 : vector<1x32xf32> to vector<8x32xf32>
    %170 = arith.mulf %168, %169 : vector<8x32xf32>
    %171 = vector.broadcast %150 : vector<1x32xf32> to vector<8x32xf32>
    %172 = arith.addf %170, %171 : vector<8x32xf32>
    %173 = vector.shape_cast %172 : vector<8x32xf32> to vector<1x8x32xf32>
    %c0_63 = arith.constant 0 : index
    %c0_64 = arith.constant 0 : index
    %c0_65 = arith.constant 0 : index
    %174 = vector.load %arg14[%c0_63, %c0_64, %c0_65] : memref<1x8x32xf32, #tpu.memory_space<vmem>>, vector<1x8x32xf32>
    tpu.vector_store %arg14[%c0_63, %c0_64, %c0_65], %173 {strides = array<i32>} : memref<1x8x32xf32, #tpu.memory_space<vmem>>, vector<1x8x32xf32>,
    return
  }
  func.func @transform_0(%arg0: i32) -> (i32, i32, i32) {
    %c0_i32 = arith.constant 0 : i32
    %c0_i32_0 = arith.constant 0 : i32
    %c0_i32_1 = arith.constant 0 : i32
    return %arg0, %c0_i32, %c0_i32_0 : i32, i32, i32
  }
  func.func @transform_1(%arg0: i32) -> (i32, i32) {
    %c0_i32 = arith.constant 0 : i32
    %c0_i32_0 = arith.constant 0 : i32
    %c0_i32_1 = arith.constant 0 : i32
    return %c0_i32, %c0_i32_0 : i32, i32
  }
  func.func @transform_2(%arg0: i32) -> (i32, i32) {
    %c0_i32 = arith.constant 0 : i32
    %c0_i32_0 = arith.constant 0 : i32
    %c0_i32_1 = arith.constant 0 : i32
    return %c0_i32, %c0_i32_0 : i32, i32
  }
  func.func @transform_3(%arg0: i32) -> (i32, i32) {
    %c0_i32 = arith.constant 0 : i32
    %c0_i32_0 = arith.constant 0 : i32
    %c0_i32_1 = arith.constant 0 : i32
    return %c0_i32, %c0_i32_0 : i32, i32
  }
  func.func @transform_4(%arg0: i32) -> (i32, i32) {
    %c0_i32 = arith.constant 0 : i32
    %c0_i32_0 = arith.constant 0 : i32
    %c0_i32_1 = arith.constant 0 : i32
    return %c0_i32, %c0_i32_0 : i32, i32
  }
  func.func @transform_5(%arg0: i32) -> (i32, i32) {
    %c0_i32 = arith.constant 0 : i32
    %c0_i32_0 = arith.constant 0 : i32
    %c0_i32_1 = arith.constant 0 : i32
    return %c0_i32, %c0_i32_0 : i32, i32
  }
  func.func @transform_6(%arg0: i32) -> (i32, i32) {
    %c0_i32 = arith.constant 0 : i32
    %c0_i32_0 = arith.constant 0 : i32
    %c0_i32_1 = arith.constant 0 : i32
    return %c0_i32, %c0_i32_0 : i32, i32
  }
  func.func @transform_7(%arg0: i32) -> (i32, i32) {
    %c0_i32 = arith.constant 0 : i32
    %c0_i32_0 = arith.constant 0 : i32
    %c0_i32_1 = arith.constant 0 : i32
    return %c0_i32, %c0_i32_0 : i32, i32
  }
  func.func @transform_8(%arg0: i32) -> (i32, i32) {
    %c0_i32 = arith.constant 0 : i32
    %c0_i32_0 = arith.constant 0 : i32
    %c0_i32_1 = arith.constant 0 : i32
    return %c0_i32, %c0_i32_0 : i32, i32
  }
  func.func @transform_9(%arg0: i32) -> (i32, i32) {
    %c0_i32 = arith.constant 0 : i32
    %c0_i32_0 = arith.constant 0 : i32
    %c0_i32_1 = arith.constant 0 : i32
    return %c0_i32, %c0_i32_0 : i32, i32
  }
  func.func @transform_10(%arg0: i32) -> (i32, i32) {
    %c0_i32 = arith.constant 0 : i32
    %c0_i32_0 = arith.constant 0 : i32
    %c0_i32_1 = arith.constant 0 : i32
    return %c0_i32, %c0_i32_0 : i32, i32
  }
  func.func @transform_11(%arg0: i32) -> (i32, i32) {
    %c0_i32 = arith.constant 0 : i32
    %c0_i32_0 = arith.constant 0 : i32
    %c0_i32_1 = arith.constant 0 : i32
    return %c0_i32, %c0_i32_0 : i32, i32
  }
  func.func @transform_12(%arg0: i32) -> (i32, i32) {
    %c0_i32 = arith.constant 0 : i32
    %c0_i32_0 = arith.constant 0 : i32
    %c0_i32_1 = arith.constant 0 : i32
    return %c0_i32, %c0_i32_0 : i32, i32
  }
  func.func @transform_13(%arg0: i32) -> (i32, i32, i32) {
    %c0_i32 = arith.constant 0 : i32
    %c0_i32_0 = arith.constant 0 : i32
    %c0_i32_1 = arith.constant 0 : i32
    return %arg0, %c0_i32, %c0_i32_0 : i32, i32, i32
  }
}

</mosaic_0001>

<bundles_post_ra>
// kernel: tpu_custom_call.1
= control target key start
LH: loop header
LB: loop body
LE: loop exit
PB: predicated region body
PF: predicated region fallthrough
CT: control target
= control target key end

     0   :  { %s2550_s0 = inlined_call_operand.vmem [shape: f32[2,8,32], index: 0, kind: input, shape index: {}]   ;;  %s2551_s1 = inlined_call_operand.vmem [shape: f32[32,96], index: 1, kind: input, shape index: {}]   ;;  %s2552_s2 = inlined_call_operand.vmem [shape: f32[1,96], index: 2, kind: input, shape index: {}]   ;;  %s2553_s3 = inlined_call_operand.vmem [shape: f32[32,32], index: 3, kind: input, shape index: {}]   ;;  %s2554_s4 = inlined_call_operand.vmem [shape: f32[1,32], index: 4, kind: input, shape index: {}]   ;;  %s2555_s5 = inlined_call_operand.vmem [shape: f32[1,32], index: 5, kind: input, shape index: {}]   ;;  %s2556_s6 = inlined_call_operand.vmem [shape: f32[1,32], index: 6, kind: input, shape index: {}]   ;;  %s2557_s7 = inlined_call_operand.vmem [shape: f32[32,128], index: 7, kind: input, shape index: {}]   ;;  %s2558_s8 = inlined_call_operand.vmem [shape: f32[1,128], index: 8, kind: input, shape index: {}]   ;;  %s2559_s9 = inlined_call_operand.vmem [shape: f32[128,32], index: 9, kind: input, shape index: {}]   ;;  %s2560_s10 = inlined_call_operand.vmem [shape: f32[1,32], index: 10, kind: input, shape index: {}]   ;;  %s2561_s11 = inlined_call_operand.vmem [shape: f32[1,32], index: 11, kind: input, shape index: {}]   ;;  %s2562_s12 = inlined_call_operand.vmem [shape: f32[1,32], index: 12, kind: input, shape index: {}]   ;;  %s2563_s13 = inlined_call_operand.hbm [shape: f32[2,8,32], index: 13, kind: output, shape index: {}]  }
   0x1   :  { %2564 = sst [smem:[#allocation6_spill]] %s2550_s0 }
   0x2   :  { %2565 = sst [smem:[#allocation7_spill]] %s2551_s1 }
   0x3   :  { %2566 = sst [smem:[#allocation8_spill]] %s2552_s2 }
   0x4   :  { %2567 = sst [smem:[#allocation9_spill]] %s2553_s3 }
   0x5   :  { %18 = vsyncpa [#allocation3], 0 }
   0x6   :  { %20 = vsyncpa [#allocation3 + $0x1], 0  ;;  %s2233_s25 = smov 0   ;;  %s2235_s26 = smov 0  }
   0x7   :  { %s2237_s27 = smov 0   ;;  %s2239_s28 = smov 0  }
   0x8 LB: > { %s2254_s29 = sadd.s32 4294967295, %s2147_s28   ;;  %s1809_s30 = sadd.s32 4294967294, %s2147_s28   ;;  %s2147_s28 = sphi %s2239_s28, %s2579_s28   ;;  %s2143_s27 = sphi %s2237_s27, %s2578_s27   ;;  %s2139_s26 = sphi %s2235_s26, %s2577_s26   ;;  %s2135_s25 = sphi %s2233_s25, %s2576_s25  }
   0x9   : > { %s2258_s14 = sadd.s32 1, %s2147_s28   ;;  %s311_s15 = sadd.s32 1, %s2143_s27 }
   0xa   : > { %s308_s16 = ssub.s32 %s2147_s28, %s2258_s14  ;;  %p321_p0 = scmp.ne.s32.totalorder %s2143_s27, %s2139_s26 }
   0xb   : > { %p309_p1 = scmp.eq.s32.totalorder %s308_s16, 0  ;;  %p322_p2 = scmp.eq.s32.totalorder %s2254_s29, 1 }
   0xc   : > { %p327_p3 = scmp.ne.s32.totalorder %s2139_s26, %s2135_s25  ;;  %p328_p4 = scmp.eq.s32.totalorder %s1809_s30, 1 }
   0xd   : > { %s2269_s17 = scalar_select %p309_p1, %s2143_s27, %s311_s15  }
   0xe   : > { %p2271_p5 = por %p322_p2, %p321_p0  ;;  %p2275_p6 = por %p328_p4, %p327_p3 }
   0xf   : > { %2568 = sst [smem:[#allocation5_spill]] %s2269_s17  ;;  %p1812_p7 = scmp.ge.s32.totalorder %s2147_s28, 1 }
  0x10   : > { %p389_p8 = scmp.lt.s32.totalorder %s2147_s28, 3 }
  0x12   : > { %p390_p9 = pnand %p1812_p7, %p389_p8 }
  0x13   : > { %s2571_s1 = sld [smem:[#allocation7_spill]] (!%p390_p9)  ;;  %p432_p10 = scmp.lt.s32.totalorder (!%p390_p9), %s2254_s29, 1 }
  0x14   : > { %393 = sbr.rel (%p390_p9) target bundleno = 4015 (0xfaf), region = 72  ;;  %s2572_s0 = sld [smem:[#allocation6_spill]] (!%p390_p9) }
  0x15   : > { %s2573_s2 = sld [smem:[#allocation8_spill]] (!%p390_p9)  ;;  %s2152_s15 = smov (!%p390_p9), 96  }
  0x16   : > { %s2154_s20 = smov (!%p390_p9), 120   ;;  %s2574_s3 = sld [smem:[#allocation9_spill]] (!%p390_p9) }
  0x17   : > { %s2155_s23 = smov (!%p390_p9), 56   ;;  %s2157_s30 = smov (!%p390_p9), 112  }
  0x18   : > { %s2160_s21 = smov (!%p390_p9), 104  }
  0x19   : > { %v440_v0 = vld [vmem:[%s2571_s1 + $0x18] sm:$0xff]  ;;  %v2149_v1 = vmov 0.0   ;;  %v439_v2 = vld [vmem:[%s2571_s1 + $0x10] sm:$0xff]  ;;  %vm2150_vm0 = vmmov 0   ;;  %s433_s24 = scalar_select %p432_p10, %s2254_s29, 1  ;;  %v438_v3 = vld [vmem:[%s2571_s1 + $0x8] sm:$0xff] }
  0x1a   : > { %1896 = vmatprep.subr.mxu0 %v2149_v1  ;;  %1904 = vmatprep.mubr.msk.f32.mxu0 %vm2150_vm0, %v2149_v1  ;;  %v437_v4 = vld [vmem:[%s2571_s1] sm:$0xff]  ;;  %vm448_vm1 = vcmask 261120   ;;  %vm529_vm2 = vcmask 64512  }
  0x1b   : > { %1897 = vmatpush3.msra.mxu0 %v440_v0  ;;  %1932 = vmatprep.subr.mxu1 %v2149_v1  ;;  %s1814_s16 = sshll.u32 %s433_s24, 3  ;;  %v1815_v6 = vld [vmem:[%s2573_s2] ss:$0 sm:$0xff]  ;;  %s2156_s24 = smov 80  }
  0x1c   : > { %1898 = vmatprep.subr.mxu0 %v2149_v1  ;;  %1934 = vmatprep.mubr.msk.f32.mxu1 %vm2150_vm0, %v2149_v1  ;;  %s435_s17 = scalar_lea.vmem %s2572_s0, %s1814_s16  ;;  %s2153_s16 = smov 88   ;;  %v522_v25 = vld [vmem:[%s2574_s3] sm:$0xff]  ;;  %v523_v42 = vld [vmem:[%s2574_s3 + $0x8] sm:$0xff]  ;;  %v524_v63 = vld [vmem:[%s2574_s3 + $0x10] sm:$0xff] }
  0x1d   : > { %1899 = vmatpush3.msra.mxu0 %v439_v2  ;;  %v2306_v5 = vld [vmem:[%s435_s17] sm:$0xff]  ;;  %s2151_s17 = smov 64   ;;  %1933 = vmatpush3.msra.mxu1 %v522_v25 }
  0x1e   : > { %1900 = vmatprep.subr.mxu0 %v2149_v1  ;;  %1942 = vmatprep.subr.mxu1 %v2149_v1 }
  0x1f   : > { %1901 = vmatpush3.msra.mxu0 %v438_v3 }
  0x20   : > { %1902 = vmatprep.subr.mxu0 %v2149_v1 }
  0x21   : > { %1903 = vmatpush3.msra.mxu0 %v437_v4 }
  0x22   : > { %1905 = vmatmul.mubr.msk.f32.vlgmr.msra.gmra.mxu0 %vm448_vm1, %v2306_v5  ;;  %1907 = vmatprep.subr.mxu0 %v2149_v1 }
  0x23   : > { %1909 = vmatprep.mubr.msk.f32.mxu0 %vm2150_vm0, %v2149_v1 }
  0xe2   : > { %v518_v7 = vpop.f32.mrf.mxu0 }
  0xe3   : > { %v2317_v8 = vadd.f32 %v1815_v6, %v518_v7 }
  0xe4   : > { %v1906_v9 = vpop.f32.mrf.mxu0 }
  0xe5   : > { %615 = vrot.lane.b32.xlu1 %v2317_v8, %s2151_s17  ;;  %527 = vrot.lane.b32.xlu0 %v2317_v8, %s2152_s15  ;;  %s2162_s17 = smov [#allocation2]  }
  0xe6   : > { %s2091_s15 = sshll.u32 %s2162_s17, 4  ;;  %s2092_s15 = int_to_ptr.vmem [resolvable:$false] %s2091_s15 }
  0xe9   : > { %693 = vrot.lane.b32.xlu1 %v2317_v8, %s2153_s16  ;;  %s2158_s16 = smov 48  }
 0x157   : > { %v528_v10 = vpop.permute.xlu0 %527  ;;  %v616_v11 = vpop.permute.xlu1 %615 }
 0x158   : > { %1908 = vmatpush3.xpose.msk.msra.mxu0 %vm529_vm2, %v528_v10 }
 0x159   : > { %1912 = vmatprep.subr.mxu0 %v2149_v1 }
 0x15b   : > { %1910 = vmatmul.mubr.msk.f32.vlgmr.msra.gmra.mxu0 %vm529_vm2, %v2317_v8  ;;  %v694_v20 = vpop.permute.xlu1 %693 }
 0x15c   : > { %1913 = vmatpush3.msra.mxu0 %v616_v11  ;;  %1914 = vmatprep.mubr.msk.f32.mxu0 %vm2150_vm0, %v2149_v1 }
 0x15d   : > { %1917 = vmatprep.subr.mxu0 %v2149_v1 }
 0x21b   : > { %v600_v12 = vpop.f32.mrf.mxu0 }
 0x21c   : > { %v604_v13 = vsel %vm529_vm2, %v600_v12, -inf }
 0x21d   : > { %605 = vmax.xlane.f32.xlu0 %v604_v13  ;;  %v1911_v14 = vpop.f32.mrf.mxu0  ;;  %v525_v13 = vld [vmem:[%s2574_s3 + $0x18] sm:$0xff] }
 0x2a6   : > { %v606_v15 = vpop.xlane.xlu0 %605 }
 0x2a7   : > { %v607_v16 = vsub.f32 %v600_v12, %v606_v15 }
 0x2a9   : > { %v608_v17 = vmul.f32 1.442695, %v607_v16 }
 0x2ab   : > { %2065 = vpow2.f32 %v608_v17 }
 0x2b8   : > { %v2066_v18 = vpop.eup %2065 }
 0x2b9   : > { %v610_v19 = vsel %vm529_vm2, %v2066_v18, 0.0 }
 0x2ba   : > { %611 = vadd.xlane.f32.xlu1 %v610_v19 }
 0x2cb   : > { %691 = vrot.lane.b32.xlu1 %v2317_v8, %s2154_s20  ;;  %s2159_s20 = smov 72  }
 0x343   : > { %v612_v21 = vpop.xlane.xlu1 %611 }
 0x344   : > { %2067 = vrcp.f32 %v612_v21 }
 0x347   : > { %v692_v24 = vpop.permute.xlu1 %691 }
 0x351   : > { %v2068_v22 = vpop.eup %2067 }
 0x352   : > { %v614_v23 = vmul.f32 %v2068_v22, %v2066_v18 }
 0x354   : > { %1915 = vmatmul.mubr.msk.f32.vlgmr.msra.gmra.mxu0 %vm529_vm2, %v614_v23 }
 0x355   : > { %1918 = vmatpush3.xpose.msk.msra.mxu0 %vm529_vm2, %v694_v20  ;;  %1919 = vmatprep.mubr.msk.f32.mxu0 %vm2150_vm0, %v2149_v1 }
 0x356   : > { %1922 = vmatprep.subr.mxu0 %v2149_v1 }
 0x358   : > { %1920 = vmatmul.mubr.msk.f32.vlgmr.msra.gmra.mxu0 %vm529_vm2, %v692_v24  ;;  %v1833_v24 = vld [vmem:[%s2554_s4] ss:$0 sm:$0xff] }
 0x359   : > { %1924 = vmatprep.mubr.msk.f32.mxu0 %vm2150_vm0, %v2149_v1 }
 0x414   : > { %v687_v26 = vpop.f32.mrf.mxu0 }
 0x415   : > { %1935 = vmatmul.mubr.msk.f32.vlgmr.msra.gmra.mxu1 %vm529_vm2, %v687_v26 }
 0x416   : > { %v1916_v27 = vpop.f32.mrf.mxu0  ;;  %1944 = vmatprep.mubr.msk.f32.mxu1 %vm2150_vm0, %v2149_v1 }
 0x418   : > { %v765_v28 = vpop.f32.mrf.mxu0 }
 0x419   : > { %v769_v29 = vsel %vm529_vm2, %v765_v28, -inf }
 0x41a   : > { %770 = vmax.xlane.f32.xlu1 %v769_v29  ;;  %v1921_v30 = vpop.f32.mrf.mxu0 }
 0x4a3   : > { %v771_v31 = vpop.xlane.xlu1 %770 }
 0x4a4   : > { %v772_v32 = vsub.f32 %v765_v28, %v771_v31 }
 0x4a6   : > { %v773_v33 = vmul.f32 1.442695, %v772_v32 }
 0x4a8   : > { %2069 = vpow2.f32 %v773_v33 }
 0x4b5   : > { %v2070_v34 = vpop.eup %2069 }
 0x4b6   : > { %v775_v35 = vsel %vm529_vm2, %v2070_v34, 0.0 }
 0x4b7   : > { %776 = vadd.xlane.f32.xlu0 %v775_v35  ;;  %v1522_v35 = vld [vmem:[%s2557_s7 + $0x18] sm:$0xff] }
 0x4cd   : > { %780 = vrot.lane.b32.xlu0 %v2317_v8, %s2155_s23  ;;  %s429_s23 = sand.u32 1, %s2139_s26  }
 0x4ce   : > { %s1737_s3 = scalar_lea.sflag [#allocation3], %s429_s23 }
 0x4d1   : > { %1004 = vrot.lane.b32.xlu0 %v2317_v8, %s2156_s24  ;;  %s2161_s24 = smov 40  }
 0x4d5   : > { %v2351_v36 = vpop.f32.mrf.mxu1  ;;  %1002 = vrot.lane.b32.xlu0 %v2317_v8, %s2157_s30 }
 0x4d7   : > { %v1936_v37 = vpop.f32.mrf.mxu1 }
 0x4d8   : > { %v1519_v37 = vld [vmem:[%s2557_s7] sm:$0xff] }
 0x540   : > { %v777_v38 = vpop.xlane.xlu0 %776 }
 0x541   : > { %2071 = vrcp.f32 %v777_v38 }
 0x544   : > { %v781_v39 = vpop.permute.xlu0 %780 }
 0x545   : > { %1923 = vmatpush3.msra.mxu0 %v781_v39 }
 0x546   : > { %1927 = vmatprep.subr.mxu0 %v2149_v1 }
 0x548   : > { %v1005_v43 = vpop.permute.xlu0 %1004 }
 0x54c   : > { %v1003_v46 = vpop.permute.xlu0 %1002 }
 0x54e   : > { %v2072_v40 = vpop.eup %2071 }
 0x54f   : > { %v779_v41 = vmul.f32 %v2072_v40, %v2070_v34 }
 0x551   : > { %1925 = vmatmul.mubr.msk.f32.vlgmr.msra.gmra.mxu0 %vm529_vm2, %v779_v41 }
 0x552   : > { %1928 = vmatpush3.msra.mxu0 %v523_v42  ;;  %1929 = vmatprep.mubr.msk.f32.mxu0 %vm2150_vm0, %v2149_v1  ;;  %v1834_v42 = vld [vmem:[%s2555_s5] ss:$0 sm:$0xff] }
 0x553   : > { %1937 = vmatprep.subr.mxu0 %v2149_v1 }
 0x611   : > { %v852_v44 = vpop.f32.mrf.mxu0 }
 0x612   : > { %1930 = vmatmul.mubr.msk.f32.vlgmr.msra.gmra.mxu0 %vm529_vm2, %v852_v44  ;;  %v1835_v44 = vld [vmem:[%s2556_s6] ss:$0 sm:$0xff] }
 0x613   : > { %1938 = vmatpush3.xpose.msk.msra.mxu0 %vm529_vm2, %v1005_v43  ;;  %v1926_v45 = vpop.f32.mrf.mxu0  ;;  %1939 = vmatprep.mubr.msk.f32.mxu0 %vm2150_vm0, %v2149_v1 }
 0x614   : > { %1947 = vmatprep.subr.mxu0 %v2149_v1 }
 0x616   : > { %1940 = vmatmul.mubr.msk.f32.vlgmr.msra.gmra.mxu0 %vm529_vm2, %v1003_v46 }
 0x617   : > { %1949 = vmatprep.mubr.msk.f32.mxu0 %vm2150_vm0, %v2149_v1  ;;  %1948 = vmatpush3.msra.mxu0 %v524_v63  ;;  %v1836_v63 = vld [vmem:[%s2558_s8] ss:$0 sm:$0xff] }
 0x618   : > { %1957 = vmatprep.subr.mxu0 %v2149_v1 }
 0x6d2   : > { %v925_v47 = vpop.f32.mrf.mxu0 }
 0x6d3   : > { %v999_v14 = vadd.f32 %v2351_v36, %v925_v47  ;;  %v1521_v36 = vld [vmem:[%s2557_s7 + $0x10] sm:$0xff]  ;;  %v1627_v47 = vld [vmem:[%s2559_s9 + $0x78] sm:$0xff] }
 0x6d4   : > { %v1931_v48 = vpop.f32.mrf.mxu0 }
 0x6d5   : > { %v1626_v48 = vld [vmem:[%s2559_s9 + $0x70] sm:$0xff] }
 0x6d6   : > { %v1076_v49 = vpop.f32.mrf.mxu0 }
 0x6d7   : > { %v1080_v50 = vsel %vm529_vm2, %v1076_v49, -inf }
 0x6d8   : > { %1081 = vmax.xlane.f32.xlu1 %v1080_v50  ;;  %v1941_v51 = vpop.f32.mrf.mxu0  ;;  %v1624_v50 = vld [vmem:[%s2559_s9 + $0x60] sm:$0xff] }
 0x6d9   : > { %v1623_v51 = vld [vmem:[%s2559_s9 + $0x58] sm:$0xff] }
 0x6e9   : > { %1091 = vrot.lane.b32.xlu1 %v2317_v8, %s2158_s16 }
 0x6ed   : > { %1243 = vrot.lane.b32.xlu1 %v2317_v8, %s2159_s20  ;;  %s1842_s20 = sshll.u32 %s2254_s29, 7  ;;  %s2093_s29 = scalar_lea.vmem %s2092_s15, 256 }
 0x6ee   : > { %s1748_s2 = scalar_lea.hbm %s2563_s13, %s1842_s20 }
 0x6f1   : > { %1241 = vrot.lane.b32.xlu1 %v2317_v8, %s2160_s21 }
 0x761   : > { %v1082_v52 = vpop.xlane.xlu1 %1081 }
 0x762   : > { %v1083_v53 = vsub.f32 %v1076_v49, %v1082_v52  ;;  %v1625_v49 = vld [vmem:[%s2559_s9 + $0x68] sm:$0xff]  ;;  %v1622_v52 = vld [vmem:[%s2559_s9 + $0x50] sm:$0xff] }
 0x764   : > { %v1084_v54 = vmul.f32 1.442695, %v1083_v53  ;;  %v1621_v53 = vld [vmem:[%s2559_s9 + $0x48] sm:$0xff] }
 0x765   : > { %v1092_v55 = vpop.permute.xlu1 %1091 }
 0x766   : > { %2073 = vpow2.f32 %v1084_v54  ;;  %1943 = vmatpush3.msra.mxu1 %v1092_v55  ;;  %v1620_v54 = vld [vmem:[%s2559_s9 + $0x40] sm:$0xff]  ;;  %v1619_v55 = vld [vmem:[%s2559_s9 + $0x38] sm:$0xff] }
 0x767   : > { %1952 = vmatprep.subr.mxu1 %v2149_v1 }
 0x769   : > { %v1244_v60 = vpop.permute.xlu1 %1243 }
 0x76d   : > { %v1242_v62 = vpop.permute.xlu1 %1241 }
 0x773   : > { %v2074_v56 = vpop.eup %2073 }
 0x774   : > { %v1086_v57 = vsel %vm529_vm2, %v2074_v56, 0.0 }
 0x775   : > { %1087 = vadd.xlane.f32.xlu0 %v1086_v57  ;;  %v1617_v57 = vld [vmem:[%s2559_s9 + $0x28] sm:$0xff] }
 0x7fe   : > { %v1088_v58 = vpop.xlane.xlu0 %1087 }
 0x7ff   : > { %2075 = vrcp.f32 %v1088_v58  ;;  %v1616_v58 = vld [vmem:[%s2559_s9 + $0x20] sm:$0xff] }
 0x80c   : > { %v2076_v59 = vpop.eup %2075 }
 0x80d   : > { %v1090_v61 = vmul.f32 %v2076_v59, %v2074_v56  ;;  %v1618_v56 = vld [vmem:[%s2559_s9 + $0x30] sm:$0xff]  ;;  %v1615_v59 = vld [vmem:[%s2559_s9 + $0x18] sm:$0xff] }
 0x80f   : > { %1945 = vmatmul.mubr.msk.f32.vlgmr.msra.gmra.mxu1 %vm529_vm2, %v1090_v61  ;;  %v1613_v61 = vld [vmem:[%s2559_s9 + $0x8] sm:$0xff] }
 0x810   : > { %1953 = vmatpush3.xpose.msk.msra.mxu1 %vm529_vm2, %v1244_v60  ;;  %1954 = vmatprep.mubr.msk.f32.mxu1 %vm2150_vm0, %v2149_v1  ;;  %v1614_v60 = vld [vmem:[%s2559_s9 + $0x10] sm:$0xff] }
 0x811   : > { %1962 = vmatprep.subr.mxu1 %v2149_v1 }
 0x813   : > { %1955 = vmatmul.mubr.msk.f32.vlgmr.msra.gmra.mxu1 %vm529_vm2, %v1242_v62  ;;  %v1612_v62 = vld [vmem:[%s2559_s9] sm:$0xff] }
 0x814   : > { %1964 = vmatprep.mubr.msk.f32.mxu1 %vm2150_vm0, %v2149_v1  ;;  %1963 = vmatpush3.msra.mxu1 %v525_v13 }
 0x815   : > { %1978 = vmatprep.subr.mxu1 %v2149_v1 }
 0x8cf   : > { %v1163_v0 = vpop.f32.mrf.mxu1 }
 0x8d0   : > { %1950 = vmatmul.mubr.msk.f32.vlgmr.msra.gmra.mxu0 %vm529_vm2, %v1163_v0 }
 0x8d1   : > { %v1946_v2 = vpop.f32.mrf.mxu1  ;;  %1959 = vmatprep.mubr.msk.f32.mxu0 %vm2150_vm0, %v2149_v1 }
 0x8d3   : > { %v1315_v3 = vpop.f32.mrf.mxu1 }
 0x8d4   : > { %v1319_v4 = vsel %vm529_vm2, %v1315_v3, -inf }
 0x8d5   : > { %1320 = vmax.xlane.f32.xlu1 %v1319_v4  ;;  %v1956_v6 = vpop.f32.mrf.mxu1 }
 0x95e   : > { %v1321_v7 = vpop.xlane.xlu1 %1320 }
 0x95f   : > { %v1322_v9 = vsub.f32 %v1315_v3, %v1321_v7 }
 0x961   : > { %v1323_v10 = vmul.f32 1.442695, %v1322_v9 }
 0x963   : > { %2077 = vpow2.f32 %v1323_v10 }
 0x970   : > { %v2078_v11 = vpop.eup %2077 }
 0x971   : > { %v1325_v12 = vsel %vm529_vm2, %v2078_v11, 0.0 }
 0x972   : > { %1326 = vadd.xlane.f32.xlu0 %v1325_v12 }
 0x988   : > { %1330 = vrot.lane.b32.xlu0 %v2317_v8, %s2161_s24  ;;  %s1813_s24 = sshll.u32 %s429_s23, 3 }
 0x989   : > { %s431_s21 = scalar_lea.vmem [#allocation2], %s1813_s24 }
 0x98a   : > { %s1750_s22 = sshll.u32 %s431_s21, 4  ;;  %s1751_s22 = int_to_ptr.vmem [resolvable:$true] %s1750_s22 }
 0x98b   : > { %s2087_s30 = scalar_lea.vmem %s1751_s22, 128  ;;  %p2094_p0 = scmp.lt.s32.totalorder %s1751_s22, %s2092_s15 }
 0x98c   : > { %p2088_p11 = scmp.ne.s32.totalorder %s1751_s22, %s2087_s30  ;;  %p2095_p1 = scmp.lt.s32.totalorder %s2093_s29, %s2087_s30 }
 0x98e   : > { %p2089_p12 = pnand %p2088_p11, %p2271_p5  ;;  %p2096_p2 = por %p2095_p1, %p2094_p0 }
 0x990   : > { %v1236_v15 = vpop.f32.mrf.mxu0  ;;  %p2090_p13 = pneg %p2089_p12 }
 0x991   : > { %v1240_v16 = vadd.f32 %v1236_v15, %v999_v14 }
 0x992   : > { %v1951_v17 = vpop.f32.mrf.mxu0  ;;  %p2097_p3 = pnand %p2096_p2, %p2090_p13 }
 0x9fb   : > { %v1327_v18 = vpop.xlane.xlu0 %1326 }
 0x9fc   : > { %2079 = vrcp.f32 %v1327_v18 }
 0x9ff   : > { %v1331_v19 = vpop.permute.xlu0 %1330 }
 0xa00   : > { %1958 = vmatpush3.msra.mxu0 %v1331_v19 }
 0xa01   : > { %1967 = vmatprep.subr.mxu0 %v2149_v1 }
 0xa09   : > { %v2080_v20 = vpop.eup %2079 }
 0xa0a   : > { %v1329_v8 = vmul.f32 %v2080_v20, %v2078_v11 }
 0xa0c   : > { %1960 = vmatmul.mubr.msk.f32.vlgmr.msra.gmra.mxu0 %vm529_vm2, %v1329_v8 }
 0xa0d   : > { %1975 = vmatprep.mubr.msk.f32.mxu0 %vm2150_vm0, %v2149_v1  ;;  %1968 = vmatpush3.msra.mxu0 %v1522_v35 }
 0xa0e   : > { %1969 = vmatprep.subr.mxu0 %v2149_v1 }
 0xa0f   : > { %1970 = vmatpush3.msra.mxu0 %v1521_v36 }
 0xa10   : > { %1971 = vmatprep.subr.mxu0 %v2149_v1 }
 0xacc   : > { %v1402_v21 = vpop.f32.mrf.mxu0 }
 0xacd   : > { %1965 = vmatmul.mubr.msk.f32.vlgmr.msra.gmra.mxu1 %vm529_vm2, %v1402_v21 }
 0xace   : > { %v1961_v22 = vpop.f32.mrf.mxu0  ;;  %2010 = vmatprep.mubr.msk.f32.mxu1 %vm2150_vm0, %v2149_v1  ;;  %1979 = vmatpush3.msra.mxu1 %v1627_v47 }
 0xacf   : > { %1980 = vmatprep.subr.mxu1 %v2149_v1 }
 0xad0   : > { %1981 = vmatpush3.msra.mxu1 %v1626_v48 }
 0xad1   : > { %1982 = vmatprep.subr.mxu1 %v2149_v1 }
 0xad2   : > { %1983 = vmatpush3.msra.mxu1 %v1625_v49 }
 0xad3   : > { %1984 = vmatprep.subr.mxu1 %v2149_v1 }
 0xad4   : > { %1985 = vmatpush3.msra.mxu1 %v1624_v50 }
 0xad5   : > { %1986 = vmatprep.subr.mxu1 %v2149_v1 }
 0xad6   : > { %1987 = vmatpush3.msra.mxu1 %v1623_v51 }
 0xad7   : > { %1988 = vmatprep.subr.mxu1 %v2149_v1 }
 0xad8   : > { %1989 = vmatpush3.msra.mxu1 %v1622_v52 }
 0xad9   : > { %1990 = vmatprep.subr.mxu1 %v2149_v1 }
 0xada   : > { %1991 = vmatpush3.msra.mxu1 %v1621_v53 }
 0xadb   : > { %1992 = vmatprep.subr.mxu1 %v2149_v1 }
 0xadc   : > { %1993 = vmatpush3.msra.mxu1 %v1620_v54 }
 0xadd   : > { %1994 = vmatprep.subr.mxu1 %v2149_v1 }
 0xade   : > { %1995 = vmatpush3.msra.mxu1 %v1619_v55 }
 0xadf   : > { %1996 = vmatprep.subr.mxu1 %v2149_v1 }
 0xae0   : > { %1997 = vmatpush3.msra.mxu1 %v1618_v56 }
 0xae1   : > { %1998 = vmatprep.subr.mxu1 %v2149_v1 }
 0xae2   : > { %1999 = vmatpush3.msra.mxu1 %v1617_v57 }
 0xae3   : > { %2000 = vmatprep.subr.mxu1 %v2149_v1 }
 0xae4   : > { %2001 = vmatpush3.msra.mxu1 %v1616_v58 }
 0xae5   : > { %2002 = vmatprep.subr.mxu1 %v2149_v1 }
 0xae6   : > { %2003 = vmatpush3.msra.mxu1 %v1615_v59 }
 0xae7   : > { %2004 = vmatprep.subr.mxu1 %v2149_v1 }
 0xae8   : > { %2005 = vmatpush3.msra.mxu1 %v1614_v60 }
 0xae9   : > { %2006 = vmatprep.subr.mxu1 %v2149_v1 }
 0xaea   : > { %2007 = vmatpush3.msra.mxu1 %v1613_v61 }
 0xaeb   : > { %2008 = vmatprep.subr.mxu1 %v2149_v1 }
 0xaec   : > { %2009 = vmatpush3.msra.mxu1 %v1612_v62 }
 0xb8d   : > { %v1475_v23 = vpop.f32.mrf.mxu1 }
 0xb8e   : > { %v1479_v25 = vadd.f32 %v1475_v23, %v1240_v16 }
 0xb8f   : > { %v1966_v26 = vpop.f32.mrf.mxu1 }
 0xb90   : > { %v1487_v27 = vadd.f32 %v1833_v24, %v1479_v25 }
 0xb92   : > { %v1488_v28 = vadd.f32 %v1487_v27, %v2306_v5  ;;  %v1520_v5 = vld [vmem:[%s2557_s7 + $0x8] sm:$0xff] }
 0xb93   : > { %1972 = vmatpush3.msra.mxu0 %v1520_v5 }
 0xb94   : > { %v1491_v29 = vsel %vm448_vm1, %v1488_v28, 0.0  ;;  %1973 = vmatprep.subr.mxu0 %v2149_v1  ;;  %v1838_v1 = vld [vmem:[%s2560_s10] ss:$0 sm:$0xff] }
 0xb95   : > { %1492 = vadd.xlane.f32.xlu0 %v1491_v29  ;;  %1974 = vmatpush3.msra.mxu0 %v1519_v37 }
 0xc1e   : > { %v1493_v30 = vpop.xlane.xlu0 %1492 }
 0xc1f   : > { %v1495_v31 = vmul.f32 0.03125, %v1493_v30  ;;  %v1840_v30 = vld [vmem:[%s2562_s12] ss:$0 sm:$0xff] }
 0xc21   : > { %v1496_v32 = vsub.f32 %v1488_v28, %v1495_v31  ;;  %v1839_v28 = vld [vmem:[%s2561_s11] ss:$0 sm:$0xff] }
 0xc23   : > { %v1497_v33 = vmul.f32 %v1496_v32, %v1496_v32 }
 0xc25   : > { %v1498_v34 = vsel %vm448_vm1, %v1497_v33, 0.0 }
 0xc26   : > { %1499 = vadd.xlane.f32.xlu1 %v1498_v34 }
 0xcaf   : > { %v1500_v38 = vpop.xlane.xlu1 %1499 }
 0xcb0   : > { %v1501_v39 = vmul.f32 0.03125, %v1500_v38 }
 0xcb2   : > { %v1502_v40 = vadd.f32 1e-06, %v1501_v39 }
 0xcb4   : > { %2081 = vrsqrt.f32 %v1502_v40 }
 0xcc1   : > { %v2082_v41 = vpop.eup %2081 }
 0xcc2   : > { %v1504_v43 = vmul.f32 %v2082_v41, %v1496_v32 }
 0xcc4   : > { %v1511_v45 = vmul.f32 %v1834_v42, %v1504_v43 }
 0xcc6   : > { %v2433_v46 = vadd.f32 %v1835_v44, %v1511_v45 }
 0xcc8   : > { %1976 = vmatmul.mubr.msk.f32.vlgmr.msra.gmra.mxu0 %vm448_vm1, %v2433_v46 }
 0xd88   : > { %v1599_v0 = vpop.f32.mrf.mxu0 }
 0xd89   : > { %v1600_v2 = vadd.f32 %v1836_v63, %v1599_v0 }
 0xd8a   : > { %v1977_v3 = vpop.f32.mrf.mxu0 }
 0xd8b   : > { %v1603_v4 = vmul.f32 %v1600_v2, %v1600_v2 }
 0xd8d   : > { %v1604_v6 = vmul.f32 %v1603_v4, %v1600_v2 }
 0xd8f   : > { %v1605_v7 = vmul.f32 0.044715, %v1604_v6 }
 0xd91   : > { %v1606_v9 = vadd.f32 %v1605_v7, %v1600_v2 }
 0xd93   : > { %v1607_v10 = vmul.f32 0.7978846, %v1606_v9 }
 0xd95   : > { %2083 = vtanh.f32 %v1607_v10 }
 0xda2   : > { %v2084_v11 = vpop.eup %2083 }
 0xda3   : > { %v1609_v12 = vadd.f32 1.0, %v2084_v11 }
 0xda5   : > { %v1610_v13 = vmul.f32 0.5, %v1609_v12 }
 0xda7   : > { %v1611_v14 = vmul.f32 %v1610_v13, %v1600_v2 }
 0xda9   : > { %2011 = vmatmul.mubr.f32.vlgmr.msra.gmra.mxu1 %v1611_v14 }
 0xe69   : > { %v1701_v15 = vpop.f32.mrf.mxu1 }
 0xe6a   : > { %v1702_v16 = vadd.f32 %v1838_v1, %v1701_v15 }
 0xe6b   : > { %v2012_v17 = vpop.f32.mrf.mxu1 }
 0xe6c   : > { %v1705_v18 = vadd.f32 %v1702_v16, %v2433_v46 }
 0xe6e   : > { %v1708_v19 = vsel %vm448_vm1, %v1705_v18, 0.0 }
 0xe6f   : > { %1709 = vadd.xlane.f32.xlu1 %v1708_v19 }
 0xef8   : > { %v1710_v20 = vpop.xlane.xlu1 %1709 }
 0xef9   : > { %v1711_v8 = vmul.f32 0.03125, %v1710_v20 }
 0xefb   : > { %v1712_v21 = vsub.f32 %v1705_v18, %v1711_v8 }
 0xefd   : > { %v1713_v22 = vmul.f32 %v1712_v21, %v1712_v21 }
 0xeff   : > { %v1714_v23 = vsel %vm448_vm1, %v1713_v22, 0.0 }
 0xf00   : > { %1715 = vadd.xlane.f32.xlu1 %v1714_v23 }
 0xf89   : > { %v1716_v24 = vpop.xlane.xlu1 %1715 }
 0xf8a   : > { %v1717_v25 = vmul.f32 0.03125, %v1716_v24 }
 0xf8c   : > { %v1718_v26 = vadd.f32 1e-06, %v1717_v25 }
 0xf8e   : > { %2085 = vrsqrt.f32 %v1718_v26 }
 0xf9b   : > { %v2086_v27 = vpop.eup %2085 }
 0xf9c   : > { %v1720_v29 = vmul.f32 %v2086_v27, %v1712_v21 }
 0xf9e   : > { %v1727_v31 = vmul.f32 %v1839_v28, %v1720_v29 }
 0xfa0   : > { %v1734_v32 = vadd.f32 %v1840_v30, %v1727_v31 }
 0xfa2   : > { %1735 = vst.msk [vmem:[%s431_s21] sm:$0xff] %vm448_vm1, %v1734_v32 }
 0xfa3   : > { %2100 = shalt.err (!%p2097_p3)
}
 0xfa4   : > { %s2101_s0 = scalar_lea.hbm %s1748_s2, 128  ;;  %s2105_s24 = scalar_lea.hbm %s2563_s13, 256 }
 0xfa5   : > { %p2102_p4 = scmp.ne.s32.totalorder %s1748_s2, %s2101_s0  ;;  %p2106_p9 = scmp.lt.s32.totalorder %s1748_s2, %s2563_s13 }
 0xfa6   : > { %p2107_p10 = scmp.lt.s32.totalorder %s2105_s24, %s2101_s0 }
 0xfa7   : > { %p2103_p7 = pnand %p2102_p4, %p2271_p5 }
 0xfa8   : > { %p2108_p11 = por %p2107_p10, %p2106_p9 }
 0xfa9   : > { %p2104_p8 = pneg %p2103_p7 }
 0xfab   : > { %p2109_p12 = pnand %p2108_p11, %p2104_p8 }
 0xfad   : > { %2112 = shalt.err (!%p2109_p12)
}
 0xfae   : > { %2013 = dma.vmem_to_hbm [thread:$0]  (%p2271_p5), %s1751_s22, 128, %s1748_s2, %s1737_s3  }
 0xfaf PF: > { %p2019_p13 = scmp.ge.s32.totalorder %s2147_s28, 2  ;;  %s1762_s21 = sand.u32 1, %s2135_s25  }
 0xfb0   : > { %s1763_s30 = scalar_lea.sflag [#allocation3], %s1762_s21 }
 0xfb1   : > { %p2016_p0 = pnand %p2019_p13, %p2275_p6 }
 0xfb3   : > { %p2017_p1 = pneg %p2016_p0 }
 0xfb5   : > { %2130 = dma.done.wait (%p2017_p1), %s1763_s30, 128  }
 0xfb6   : > { %2132 = vsyncadd (%p2017_p1), %s1763_s30, 4294967168  ;;  %s2575_s17 = sld [smem:[#allocation5_spill]]  ;;  %p23_p2 = scmp.ge.s32.totalorder %s2258_s14, 4  }
 0xfb7   : > { %s2576_s25 = smov %s2139_s26  ;;  %s2577_s26 = smov %s2143_s27 }
 0xfb8   : > { %s2579_s28 = smov %s2258_s14  ;;  %25 = sbr.rel (!%p23_p2) target bundleno = 8 (0x8), region = 107 }
 0xfbc   : > { %s2578_s27 = smov %s2575_s17 }
 0xfbd   :  { %1768 = vsyncpa [#allocation3], 1 }
 0xfbe   :  { %1770 = vsyncpa [#allocation3 + $0x1], 1 }

</bundles_post_ra>
